<compile_context>
chip_gen: v5e
topology: v5e:2x2
jax: 0.10.0
libtpu: 0.0.40
codegen_flags: <defaults>
</compile_context>

<pallas_src>
import jax
import jax.numpy as jnp
from jax.experimental import pallas as pl
from jax.experimental.pallas import tpu as pltpu


def attention_aggregator_kernel(x_ref, mask_ref, w1_ref, b1_ref, wa_ref, ba_ref, out_ref):
    BB, G, Din = x_ref.shape
    Dout = w1_ref.shape[1]

    # Fused MLP matmul over all BB*G member rows of this block (bf16 in, f32 acc).
    x2 = x_ref[...].reshape(BB * G, Din)                               # (BB*G, Din)
    h2 = jnp.tanh(
        jax.nn.sigmoid(
            jnp.dot(x2, w1_ref[...], preferred_element_type=jnp.float32) + b1_ref[...]
        )
    )                                                                  # (BB*G, Dout) f32
    h3 = h2.reshape(BB, G, Dout)                                       # (BB, G, Dout)

    # Attention head: tanh(Linear(h)) with a single output unit.
    # An N=1 MXU matmul is wasteful -> VPU multiply + lane reduce instead.
    a = jnp.tanh(
        jnp.sum(h3 * wa_ref[...], axis=-1) + ba_ref[...]               # (BB, G) f32
    )

    # Softmax over the group dimension (dim=1 in PyTorch), lane-dense (BB, G) layout.
    logits = a + mask_ref[...]                                         # (BB, G)
    logits = logits - jnp.max(logits, axis=-1, keepdims=True)
    e = jnp.exp(logits)
    denom = jnp.sum(e, axis=-1, keepdims=True)
    w = e * pl.reciprocal(denom, approx=True)                          # (BB, G)

    # ret = matmul(h^T, weight).squeeze(2)  ==  sum_g h[b,g,:] * w[b,g]
    ret = jnp.sum(h3 * w[:, :, None], axis=1)                          # (BB, Dout)
    out_ref[...] = ret.astype(out_ref.dtype)


def attention_aggregator(x, mask, w1, b1, wa, ba, *, block_b=256):
    """x: (B, G, D_in) (bf16 or f32), mask: (B, G) additive mask,
    w1: (D_in, D_out), b1: (D_out,), wa: (D_out,), ba: (1,).
    Returns (B, D_out) f32."""
    B, G, Din = x.shape
    Dout = w1.shape[1]

    # Block over the batch axis: multiple of 8 for sublane-aligned (BB, G)/(BB, Dout)
    # blocks; pad B up to a multiple of BB (padded rows are sliced off at the end).
    BB = max(8, min(block_b, B))
    BB = -(-BB // 8) * 8
    Bp = -(-B // BB) * BB
    if Bp != B:
        x = jnp.pad(x, ((0, Bp - B), (0, 0), (0, 0)))
        mask = jnp.pad(mask, ((0, Bp - B), (0, 0)))

    mask2 = mask.astype(jnp.float32)                       # (Bp, G), lane-dense
    b1r = b1.reshape(1, Dout).astype(jnp.float32)
    war = wa.reshape(1, Dout).astype(jnp.float32)          # row vector -> VPU path
    bar = ba.reshape(1, 1).astype(jnp.float32)             # (1,1), broadcast-added

    grid = (Bp // BB,)

    out = pl.pallas_call(
        attention_aggregator_kernel,
        out_shape=jax.ShapeDtypeStruct((Bp, Dout), jnp.float32),
        grid=grid,
        in_specs=[
            pl.BlockSpec((BB, G, Din), lambda i: (i, 0, 0)),           # x (bf16)
            pl.BlockSpec((BB, G), lambda i: (i, 0)),                   # mask (f32)
            pl.BlockSpec((Din, Dout), lambda i: (0, 0)),               # W1 (bf16)
            pl.BlockSpec((1, Dout), lambda i: (0, 0)),                 # b1 row (f32)
            pl.BlockSpec((1, Dout), lambda i: (0, 0)),                 # wa row (f32)
            pl.BlockSpec((1, 1), lambda i: (0, 0)),                    # ba (f32)
        ],
        out_specs=pl.BlockSpec((BB, Dout), lambda i: (i, 0)),
        compiler_params=pltpu.CompilerParams(dimension_semantics=("parallel",)),
    )(x, mask2, w1, b1r, war, bar)

    return out[:B]


def reference(x, mask, w1, b1, wa, ba):
    xf = x.astype(jnp.float32)
    w1f = w1.astype(jnp.float32)
    h = jnp.tanh(jax.nn.sigmoid(xf @ w1f + b1))                        # (B, G, Dout)
    a = jnp.tanh(h @ wa.reshape(-1, 1).astype(jnp.float32) + ba)       # (B, G, 1)
    w = jax.nn.softmax(a + mask[:, :, None], axis=1)                   # (B, G, 1)
    return jnp.einsum("bgd,bgo->bd", h, w)                             # (B, Dout)


if __name__ == "__main__":
    B, G, Din, Dout = 12, 8, 32, 32
    key = jax.random.PRNGKey(0)
    kx, km, kw1, kwa, kba = jax.random.split(key, 5)

    # bf16 activations/weights (kernel is memory-bound; f32 accumulation on the MXU).
    x = jax.random.normal(kx, (B, G, Din), dtype=jnp.float32).astype(jnp.bfloat16)
    # additive mask: 0 for valid members, -1e9 for padded members
    valid = jax.random.bernoulli(km, 0.8, (B, G))
    mask = jnp.where(valid, 0.0, -1e9).astype(jnp.float32)
    mask = mask.at[:, 0].set(0.0)  # ensure at least one valid member per group

    # Deterministic parameter init (xavier-uniform MLP weight, zero bias, small
    # uniform attention head) -- synthetic, not a checkpoint load.
    xav = jnp.sqrt(6.0 / (Din + Dout))
    w1 = jax.random.uniform(kw1, (Din, Dout), minval=-xav, maxval=xav,
                            dtype=jnp.float32).astype(jnp.bfloat16)
    b1 = jnp.zeros((Dout,), dtype=jnp.float32)
    bound = 1.0 / jnp.sqrt(Dout)
    wa = jax.random.uniform(kwa, (Dout,), minval=-bound, maxval=bound, dtype=jnp.float32)
    ba = jax.random.uniform(kba, (1,), minval=-bound, maxval=bound, dtype=jnp.float32)

    # block_b=8 -> BB=8, B padded 12->16, grid=(2,): exercises batching, padding,
    # and an even grid (both cores busy when megacore/2-TC sharding applies).
    out = attention_aggregator(x, mask, w1, b1, wa, ba, block_b=8)
    out = jax.block_until_ready(out)

    ref = reference(x, mask, w1, b1, wa, ba)
    assert out.shape == (B, Dout)
    # bf16 operands + approx reciprocal in the softmax denominator -> relaxed tolerance.
    assert jnp.allclose(out, ref, atol=1e-2, rtol=1e-2), (out, ref)

    print("KERNEL_OK")
</pallas_src>

<mosaic_0001>
module attributes {stable_mosaic.version = 11 : i64} {
  func.func @attention_aggregator_kernel(%arg0: i32, %arg1: memref<8x8x32xbf16, #tpu.memory_space<vmem>>, %arg2: memref<8x8xf32, #tpu.memory_space<vmem>>, %arg3: memref<32x32xbf16, #tpu.memory_space<vmem>>, %arg4: memref<1x32xf32, #tpu.memory_space<vmem>>, %arg5: memref<1x32xf32, #tpu.memory_space<vmem>>, %arg6: memref<1x1xf32, #tpu.memory_space<vmem>>, %arg7: memref<8x32xf32, #tpu.memory_space<vmem>>) attributes {dimension_semantics = [#tpu.dimension_semantics<parallel>], iteration_bounds = array<i64: 2>, scalar_prefetch = 0 : i64, scratch_operands = 0 : i64, tpu.core_type = #tpu.core_type<tc>, window_params = [{transform_indices = @transform_0, window_bounds = array<i64: 8, 8, 32>}, {transform_indices = @transform_1, window_bounds = array<i64: 8, 8>}, {pipeline_mode = #tpu.pipeline_mode<synchronous>, transform_indices = @transform_2, window_bounds = array<i64: 32, 32>}, {pipeline_mode = #tpu.pipeline_mode<synchronous>, transform_indices = @transform_3, window_bounds = array<i64: 1, 32>}, {pipeline_mode = #tpu.pipeline_mode<synchronous>, transform_indices = @transform_4, window_bounds = array<i64: 1, 32>}, {pipeline_mode = #tpu.pipeline_mode<synchronous>, transform_indices = @transform_5, window_bounds = array<i64: 1, 1>}, {transform_indices = @transform_6, window_bounds = array<i64: 8, 32>}]} {
    %c0 = arith.constant 0 : index
    %c0_0 = arith.constant 0 : index
    %c0_1 = arith.constant 0 : index
    %0 = vector.load %arg1[%c0, %c0_0, %c0_1] : memref<8x8x32xbf16, #tpu.memory_space<vmem>>, vector<8x8x32xbf16>
    %1 = vector.shape_cast %0 : vector<8x8x32xbf16> to vector<64x32xbf16>
    %c0_2 = arith.constant 0 : index
    %c0_3 = arith.constant 0 : index
    %2 = vector.load %arg3[%c0_2, %c0_3] : memref<32x32xbf16, #tpu.memory_space<vmem>>, vector<32x32xbf16>
    %cst = arith.constant dense<0.000000e+00> : vector<64x32xf32>
    %3 = tpu.matmul %1, %2, %cst {dimension_numbers = #tpu.dot_dimension_numbers<[1], [0], [0], [1], [0, 0, 1, 1], [], []>} : vector<64x32xbf16>, vector<32x32xbf16>, vector<64x32xf32> -> vector<64x32xf32>
    %c0_4 = arith.constant 0 : index
    %c0_5 = arith.constant 0 : index
    %4 = vector.load %arg4[%c0_4, %c0_5] : memref<1x32xf32, #tpu.memory_space<vmem>>, vector<1x32xf32>
    %5 = vector.broadcast %4 : vector<1x32xf32> to vector<64x32xf32>
    %6 = arith.addf %3, %5 : vector<64x32xf32>
    %7 = arith.negf %6 : vector<64x32xf32>
    %8 = math.exp %7 : vector<64x32xf32>
    %cst_6 = arith.constant 1.000000e+00 : f32
    %9 = vector.broadcast %cst_6 : f32 to vector<64x32xf32>
    %10 = arith.addf %9, %8 : vector<64x32xf32>
    %11 = arith.divf %9, %10 : vector<64x32xf32>
    %12 = math.tanh %11 : vector<64x32xf32>
    %13 = vector.shape_cast %12 : vector<64x32xf32> to vector<8x8x32xf32>
    %c0_7 = arith.constant 0 : index
    %c0_8 = arith.constant 0 : index
    %14 = vector.load %arg5[%c0_7, %c0_8] : memref<1x32xf32, #tpu.memory_space<vmem>>, vector<1x32xf32>
    %15 = vector.shape_cast %14 : vector<1x32xf32> to vector<1x1x32xf32>
    %16 = vector.broadcast %15 : vector<1x1x32xf32> to vector<8x8x32xf32>
    %17 = arith.mulf %13, %16 : vector<8x8x32xf32>
    %cst_9 = arith.constant dense<0.000000e+00> : vector<8x8xf32>
    %18 = vector.multi_reduction <add>, %17, %cst_9 [2] : vector<8x8x32xf32> to vector<8x8xf32>
    %c0_10 = arith.constant 0 : index
    %c0_11 = arith.constant 0 : index
    %19 = vector.load %arg6[%c0_10, %c0_11] : memref<1x1xf32, #tpu.memory_space<vmem>>, vector<1x1xf32>
    %20 = vector.broadcast %19 : vector<1x1xf32> to vector<8x8xf32>
    %21 = arith.addf %18, %20 : vector<8x8xf32>
    %22 = math.tanh %21 : vector<8x8xf32>
    %c0_12 = arith.constant 0 : index
    %c0_13 = arith.constant 0 : index
    %23 = vector.load %arg2[%c0_12, %c0_13] : memref<8x8xf32, #tpu.memory_space<vmem>>, vector<8x8xf32>
    %24 = arith.addf %22, %23 : vector<8x8xf32>
    %cst_14 = arith.constant dense<0xFF800000> : vector<8xf32>
    %25 = vector.multi_reduction <maximumf>, %24, %cst_14 [1] : vector<8x8xf32> to vector<8xf32>
    %26 = vector.shape_cast %25 : vector<8xf32> to vector<8x1xf32>
    %27 = vector.broadcast %26 : vector<8x1xf32> to vector<8x8xf32>
    %28 = arith.subf %24, %27 : vector<8x8xf32>
    %29 = math.exp %28 : vector<8x8xf32>
    %cst_15 = arith.constant dense<0.000000e+00> : vector<8xf32>
    %30 = vector.multi_reduction <add>, %29, %cst_15 [1] : vector<8x8xf32> to vector<8xf32>
    %31 = vector.shape_cast %30 : vector<8xf32> to vector<8x1xf32>
    %32 = tpu.reciprocal %31 {approx = true} : vector<8x1xf32> -> vector<8x1xf32>
    %33 = vector.broadcast %32 : vector<8x1xf32> to vector<8x8xf32>
    %34 = arith.mulf %29, %33 : vector<8x8xf32>
    %35 = vector.shape_cast %34 : vector<8x8xf32> to vector<8x8x1xf32>
    %36 = vector.broadcast %35 : vector<8x8x1xf32> to vector<8x8x32xf32>
    %37 = arith.mulf %13, %36 : vector<8x8x32xf32>
    %cst_16 = arith.constant dense<0.000000e+00> : vector<8x32xf32>
    %38 = vector.multi_reduction <add>, %37, %cst_16 [1] : vector<8x8x32xf32> to vector<8x32xf32>
    %c0_17 = arith.constant 0 : index
    %c0_18 = arith.constant 0 : index
    %39 = vector.load %arg7[%c0_17, %c0_18] : memref<8x32xf32, #tpu.memory_space<vmem>>, vector<8x32xf32>
    tpu.vector_store %arg7[%c0_17, %c0_18], %38 {strides = array<i32>} : memref<8x32xf32, #tpu.memory_space<vmem>>, vector<8x32xf32>,
    return
  }
  func.func @transform_0(%arg0: i32) -> (i32, i32, i32) {
    %c0_i32 = arith.constant 0 : i32
    %c0_i32_0 = arith.constant 0 : i32
    %c0_i32_1 = arith.constant 0 : i32
    return %arg0, %c0_i32, %c0_i32_0 : i32, i32, i32
  }
  func.func @transform_1(%arg0: i32) -> (i32, i32) {
    %c0_i32 = arith.constant 0 : i32
    %c0_i32_0 = arith.constant 0 : i32
    return %arg0, %c0_i32 : i32, i32
  }
  func.func @transform_2(%arg0: i32) -> (i32, i32) {
    %c0_i32 = arith.constant 0 : i32
    %c0_i32_0 = arith.constant 0 : i32
    %c0_i32_1 = arith.constant 0 : i32
    return %c0_i32, %c0_i32_0 : i32, i32
  }
  func.func @transform_3(%arg0: i32) -> (i32, i32) {
    %c0_i32 = arith.constant 0 : i32
    %c0_i32_0 = arith.constant 0 : i32
    %c0_i32_1 = arith.constant 0 : i32
    return %c0_i32, %c0_i32_0 : i32, i32
  }
  func.func @transform_4(%arg0: i32) -> (i32, i32) {
    %c0_i32 = arith.constant 0 : i32
    %c0_i32_0 = arith.constant 0 : i32
    %c0_i32_1 = arith.constant 0 : i32
    return %c0_i32, %c0_i32_0 : i32, i32
  }
  func.func @transform_5(%arg0: i32) -> (i32, i32) {
    %c0_i32 = arith.constant 0 : i32
    %c0_i32_0 = arith.constant 0 : i32
    %c0_i32_1 = arith.constant 0 : i32
    return %c0_i32, %c0_i32_0 : i32, i32
  }
  func.func @transform_6(%arg0: i32) -> (i32, i32) {
    %c0_i32 = arith.constant 0 : i32
    %c0_i32_0 = arith.constant 0 : i32
    return %arg0, %c0_i32 : i32, i32
  }
}

</mosaic_0001>

<bundles_post_ra>
// kernel: tpu_custom_call.1
= control target key start
LH: loop header
LB: loop body
LE: loop exit
PB: predicated region body
PF: predicated region fallthrough
CT: control target
= control target key end

     0   :  { %s1851_s0 = inlined_call_operand.hbm [shape: bf16[16,8,32], index: 0, kind: input, shape index: {}]   ;;  %s1852_s1 = inlined_call_operand.vmem [shape: f32[16,8], index: 1, kind: input, shape index: {}]   ;;  %s1853_s2 = inlined_call_operand.vmem [shape: bf16[32,32], index: 2, kind: input, shape index: {}]   ;;  %s1854_s3 = inlined_call_operand.vmem [shape: f32[1,32], index: 3, kind: input, shape index: {}]   ;;  %s1855_s4 = inlined_call_operand.vmem [shape: f32[1,32], index: 4, kind: input, shape index: {}]   ;;  %s1856_s5 = inlined_call_operand.<no memory space> [shape: f32[1,1], index: 5, kind: input, shape index: {}]   ;;  %s1857_s6 = inlined_call_operand.hbm [shape: f32[16,32], index: 6, kind: output, shape index: {}]  }
   0x1   :  { %v11_v0 = vstv %s1856_s5 }
   0x2   :  { %12 = vst [vmem:[#allocation2] sm:$0x1] %v11_v0 }
   0x3   :  { %13 = vsyncpa [#allocation4], 0 }
   0x4   :  { %15 = vsyncpa [#allocation4 + $0x1], 0 }
   0x5   :  { %16 = vsyncpa [#allocation5], 0 }
   0x6   :  { %18 = vsyncpa [#allocation5 + $0x1], 0  ;;  %s1417_s23 = smov 0   ;;  %s1419_s24 = smov 0  }
   0x7   :  { %s1421_s25 = smov 0   ;;  %s1423_s26 = smov 0  }
   0x8 LB: > { %s1438_s5 = sadd.s32 4294967295, %s1374_s26   ;;  %s1074_s27 = sadd.s32 4294967294, %s1374_s26   ;;  %s1374_s26 = sphi %s1423_s26, %s1883_s26   ;;  %s1370_s25 = sphi %s1421_s25, %s1882_s25   ;;  %s1366_s24 = sphi %s1419_s24, %s1881_s24   ;;  %s1362_s23 = sphi %s1417_s23, %s1880_s23  }
   0x9   : > { %s1442_s28 = sadd.s32 1, %s1374_s26   ;;  %s31_s29 = sadd.s32 1, %s1370_s25 }
   0xa   : > { %s28_s30 = ssub.s32 %s1374_s26, %s1442_s28  ;;  %p38_p0 = scmp.ne.s32.totalorder %s1370_s25, %s1366_s24 }
   0xb   : > { %p29_p1 = scmp.eq.s32.totalorder %s28_s30, 0  ;;  %p39_p2 = scmp.eq.s32.totalorder %s1374_s26, 0 }
   0xc   : > { %p44_p3 = scmp.ne.s32.totalorder %s1366_s24, %s1362_s23  ;;  %p45_p4 = scmp.eq.s32.totalorder %s1438_s5, 0 }
   0xd   : > { %s1454_s7 = scalar_select %p29_p1, %s1370_s25, %s31_s29  }
   0xe   : > { %p1456_p5 = por %p39_p2, %p38_p0  ;;  %p1460_p6 = por %p45_p4, %p44_p3 }
   0xf   : > { %p178_p7 = scmp.eq.s32.totalorder %s1438_s5, 1  ;;  %p184_p8 = scmp.eq.s32.totalorder %s1074_s27, 1 }
  0x10   : > { %p1149_p10 = scmp.lt.s32.totalorder %s1374_s26, 2  ;;  %s216_s12 = sand.u32 1, %s1370_s25  }
  0x11   : > { %p1467_p11 = por %p178_p7, %p38_p0  ;;  %p1471_p12 = por %p184_p8, %p44_p3 }
  0x12   : > { %s1124_s13 = sshll.u32 %s1374_s26, 5  ;;  %s1077_s14 = sshll.u32 %s216_s12, 5 }
  0x13   : > { %s225_s17 = scalar_lea.hbm %s1851_s0, %s1124_s13  ;;  %s220_s19 = scalar_lea.vmem [#allocation3], %s1077_s14 }
  0x14   : > { %s226_s18 = sshll.u32 %s225_s17, 4  ;;  %s228_s20 = sshll.u32 %s220_s19, 4  ;;  %s227_s18 = int_to_ptr.hbm [resolvable:$true] %s226_s18  ;;  %s229_s20 = int_to_ptr.vmem [resolvable:$true] %s228_s20 }
  0x15   : > { %p1482_p13 = pnand %p1149_p10, %p1456_p5  ;;  %p1080_p0 = scmp.ge.s32.totalorder %s1374_s26, 1 }
  0x16   : > { %p243_p1 = scmp.lt.s32.totalorder %s1374_s26, 3  ;;  %s217_s22 = scalar_lea.sflag [#allocation4], %s216_s12 }
  0x17   : > { %s1278_s27 = sshra.s32 %s227_s18, 4  ;;  %p1282_p3 = pneg %p1482_p13  ;;  %s1279_s27 = int_to_ptr.hbm [resolvable:$true] %s1278_s27 }
  0x18   : > { %s1280_s29 = scalar_lea.hbm %s1279_s27, 32  ;;  %s1285_s8 = scalar_lea.hbm %s1851_s0, 64 }
  0x19   : > { %p1281_p2 = scmp.ne.s32.totalorder %s1279_s27, %s1280_s29  ;;  %p1286_p5 = scmp.lt.s32.totalorder %s1279_s27, %s1851_s0 }
  0x1a   : > { %p1287_p8 = scmp.lt.s32.totalorder %s1285_s8, %s1280_s29 }
  0x1b   : > { %p1283_p4 = pnand %p1282_p3, %p1281_p2 }
  0x1c   : > { %p1288_p10 = por %p1287_p8, %p1286_p5 }
  0x1d   : > { %p1284_p7 = pneg %p1283_p4 }
  0x1f   : > { %p1289_p9 = pnand %p1288_p10, %p1284_p7 }
  0x21   : > { %1292 = shalt.err (!%p1289_p9)
}
  0x22   : > { %s1376_s12 = smov 64   ;;  %s1377_s16 = smov 4  }
  0x23   : > { %1144 = dma.hbm_to_vmem [thread:$0]  (!%p1482_p13), %s227_s18, 512, %s229_s20, %s217_s22, %s1376_s12, %s1376_s12, %s1377_s16  }
  0x24   : > { %p244_p2 = pnand %p1080_p0, %p243_p1 }
  0x25   : > { %s1503_s17 = sand.u32 (!%p244_p2), 1, %s1366_s24  }
  0x26   : > { %247 = sbr.rel (%p244_p2) target bundleno = 1078 (0x436), region = 44  ;;  %s1081_s19 = sshll.u32 (!%p244_p2), %s1503_s17, 5 }
  0x27   : > { %s250_s27 = scalar_lea.sflag (!%p244_p2), [#allocation4], %s1503_s17  ;;  %s253_s29 = scalar_lea.vmem (!%p244_p2), [#allocation3], %s1081_s19 }
  0x2b   : > { %1353 = dma.done.wait (%p1460_p6), %s250_s27, 512  }
  0x2c   : > { %1355 = vsyncadd (%p1460_p6), %s250_s27, 4294966784  ;;  %v605_v1 = vlaneseq  ;;  %v1378_v2 = vmov 0   ;;  %v1130_v4 = vld [vmem:[%s1853_s2 + $0x8] sm:$0xff]  ;;  %v1129_v5 = vld [vmem:[%s1853_s2] sm:$0xff]  ;;  %vm341_vm0 = vcmask 261120   ;;  %p288_p6 = scmp.lt.s32.totalorder %s1438_s5, 1 }
  0x2d   : > { %1186 = vset.pattern.permute.xlu1 %v1378_v2  ;;  %360 = vmatpush.bf16.msra.mxu0 %v1130_v4  ;;  %v1193_v6 = vld [vmem:[#allocation2] ss:$0 sm:$0xff]  ;;  %v1125_v7 = vld [vmem:[%s253_s29] sm:$0xff]  ;;  %v1126_v8 = vld [vmem:[%s253_s29 + $0x8] sm:$0xff]  ;;  %s1082_s27 = sshll.u32 %s1503_s17, 3  ;;  %s1328_s12 = scalar_lea.hbm %s1857_s6, 16 }
  0x2e   : > { %v606_v3 = vshrl.u32 %v605_v1, 7  ;;  %1131 = vmatpush.bf16.msra.mxu1 %v1130_v4  ;;  %1132 = vmatpush.bf16.msra.mxu2 %v1130_v4  ;;  %v1127_v9 = vld [vmem:[%s253_s29 + $0x10] sm:$0xff]  ;;  %v1128_v10 = vld [vmem:[%s253_s29 + $0x18] sm:$0xff]  ;;  %s289_s9 = scalar_select %p288_p6, %s1438_s5, 1 }
  0x2f   : > { %1133 = vmatpush.bf16.msra.mxu3 %v1130_v4  ;;  %583 = vperm.xlu1 %1186, %v1193_v6   ;;  %v1194_v13 = vld [vmem:[%s1854_s3] ss:$0 sm:$0xff]  ;;  %s1121_s29 = sshll.u32 %s1438_s5, 3  ;;  %s286_s5 = scalar_lea.vmem [#allocation6], %s1082_s27 }
  0x30   : > { %1187 = vset.pattern.permute.xlu2 %v606_v3  ;;  %1188 = vset.pattern.permute.xlu0 %v606_v3  ;;  %s1083_s30 = sshll.u32 %s289_s9, 3  ;;  %s987_s21 = scalar_lea.hbm %s1857_s6, %s1121_s29 }
  0x31   : > { %361 = vmatpush.bf16.msra.mxu0 %v1129_v5  ;;  %s291_s14 = scalar_lea.vmem %s1852_s1, %s1083_s30  ;;  %s989_s22 = sshll.u32 %s286_s5, 4  ;;  %s990_s22 = int_to_ptr.vmem [resolvable:$true] %s989_s22 }
  0x32   : > { %1134 = vmatpush.bf16.msra.mxu1 %v1129_v5  ;;  %1135 = vmatpush.bf16.msra.mxu2 %v1129_v5  ;;  %v1528_v11 = vld [vmem:[%s291_s14] sm:$0xff]  ;;  %s991_s9 = sshll.u32 %s987_s21, 4  ;;  %s977_s30 = scalar_lea.sflag [#allocation5], %s1503_s17  ;;  %s992_s9 = int_to_ptr.hbm [resolvable:$true] %s991_s9 }
  0x33   : > { %1136 = vmatpush.bf16.msra.mxu3 %v1129_v5  ;;  %v604_v12 = vperm.slane %v1528_v11, 0  ;;  %s1322_s13 = sshra.s32 %s992_s9, 4  ;;  %s1323_s13 = int_to_ptr.hbm [resolvable:$true] %s1322_s13 }
  0x34   : > { %1108 = vmatmul.msk.bf16.vlgmr.msra.gmra.mxu0 %vm341_vm0, %v1125_v7  ;;  %s1324_s8 = scalar_lea.hbm %s1323_s13, 8  ;;  %p1329_p1 = scmp.lt.s32.totalorder %s1323_s13, %s1857_s6 }
  0x35   : > { %1109 = vmatmul.msk.bf16.vlgmr.msra.gmra.mxu1 %vm341_vm0, %v1126_v8  ;;  %1110 = vmatmul.msk.bf16.vlgmr.msra.gmra.mxu2 %vm341_vm0, %v1127_v9  ;;  %p1325_p9 = scmp.ne.s32.totalorder %s1323_s13, %s1324_s8  ;;  %p1330_p3 = scmp.lt.s32.totalorder %s1328_s12, %s1324_s8 }
  0x36   : > { %1111 = vmatmul.msk.bf16.vlgmr.msra.gmra.mxu3 %vm341_vm0, %v1128_v10 }
  0x37   : > { %1189 = vset.pattern.permute.xlu1 %v606_v3  ;;  %p1326_p13 = pnand %p1325_p9, %p1467_p11  ;;  %p1331_p4 = por %p1330_p3, %p1329_p1 }
  0x38   : > { %609 = vperm.xlu2 %1187, %v604_v12  }
  0x39   : > { %p1327_p0 = pneg %p1326_p13 }
  0x3b   : > { %p1332_p7 = pnand %p1331_p4, %p1327_p0 }
  0xb1   : > { %v363_v14 = vpop.f32.mrf.mxu0 }
  0xb2   : > { %v368_v15 = vpop.f32.mrf.mxu1  ;;  %v364_v16 = vadd.f32 %v1194_v13, %v363_v14 }
  0xb3   : > { %v369_v17 = vadd.f32 %v1194_v13, %v368_v15 }
  0xb4   : > { %v1112_v18 = vmul.f32 -1.442695, %v364_v16 }
  0xb5   : > { %v1114_v19 = vmul.f32 -1.442695, %v369_v17 }
  0xb6   : > { %1196 = vpow2.f32 %v1112_v18 }
  0xb7   : > { %1198 = vpow2.f32 %v1114_v19 }
  0xb8   : > { %v373_v20 = vpop.f32.mrf.mxu2 }
  0xb9   : > { %v378_v21 = vpop.f32.mrf.mxu3  ;;  %v374_v22 = vadd.f32 %v1194_v13, %v373_v20  ;;  %v365_v24 = vpop.f32.mrf.mxu0 }
  0xba   : > { %v379_v23 = vadd.f32 %v1194_v13, %v378_v21  ;;  %v370_v25 = vpop.f32.mrf.mxu1  ;;  %v366_v26 = vadd.f32 %v1194_v13, %v365_v24 }
  0xbb   : > { %v371_v27 = vadd.f32 %v1194_v13, %v370_v25  ;;  %v1116_v28 = vmul.f32 -1.442695, %v374_v22 }
  0xbc   : > { %v1118_v29 = vmul.f32 -1.442695, %v379_v23  ;;  %v1197_v30 = vpop.eup %1196  ;;  %v1113_v33 = vmul.f32 -1.442695, %v366_v26 }
  0xbd   : > { %v1199_v31 = vpop.eup %1198  ;;  %v1534_v32 = vadd.f32 1.0, %v1197_v30  ;;  %1200 = vpow2.f32 %v1116_v28  ;;  %v1115_v35 = vmul.f32 -1.442695, %v371_v27 }
  0xbe   : > { %v1536_v34 = vadd.f32 1.0, %v1199_v31  ;;  %1202 = vpow2.f32 %v1118_v29 }
  0xbf   : > { %1204 = vrcp.f32 %v1534_v32  ;;  %v424_v40 = vand.u32 2147483647, %v1534_v32  ;;  %vm420_vm1 = vweird.f32 %v1534_v32  ;;  %v426_v50 = vand.u32 2147483648, %v1534_v32 }
  0xc0   : > { %1206 = vrcp.f32 %v1536_v34  ;;  %v375_v36 = vpop.f32.mrf.mxu2  ;;  %v454_v43 = vand.u32 2147483647, %v1536_v34  ;;  %v456_v44 = vand.u32 2147483648, %v1536_v34  ;;  %vm450_vm2 = vweird.f32 %v1536_v34 }
  0xc1   : > { %v380_v37 = vpop.f32.mrf.mxu3  ;;  %1208 = vpow2.f32 %v1113_v33  ;;  %v376_v38 = vadd.f32 %v1194_v13, %v375_v36  ;;  %vm1552_vm3 = vcmp.eq.f32.partialorder %v424_v40, 8.507059e+37  ;;  %v427_v0 = vor.u32 1.1754944e-38, %v426_v50 }
  0xc2   : > { %v381_v39 = vadd.f32 %v1194_v13, %v380_v37  ;;  %1210 = vpow2.f32 %v1115_v35  ;;  %vm1558_vm4 = vcmp.eq.f32.partialorder %v454_v43, 8.507059e+37  ;;  %v457_v57 = vor.u32 1.1754944e-38, %v456_v44 }
  0xc3   : > { %v1201_v41 = vpop.eup %1200  ;;  %v1117_v42 = vmul.f32 -1.442695, %v376_v38  ;;  %v1616_v38 = vld [vmem:[%s1855_s4] ss:$0 sm:$0xff] }
  0xc4   : > { %v1203_v45 = vpop.eup %1202  ;;  %v1543_v46 = vadd.f32 1.0, %v1201_v41  ;;  %v1119_v47 = vmul.f32 -1.442695, %v381_v39 }
  0xc5   : > { %v1205_v48 = vpop.eup %1204  ;;  %v1545_v49 = vadd.f32 1.0, %v1203_v45  ;;  %1212 = vpow2.f32 %v1117_v42 }
  0xc6   : > { %v1207_v51 = vpop.eup %1206  ;;  %v416_v52 = vmul.f32 %v1205_v48, %v1534_v32  ;;  %1214 = vrcp.f32 %v1543_v46  ;;  %v486_v61 = vand.u32 2147483648, %v1543_v46  ;;  %v484_v3 = vand.u32 2147483647, %v1543_v46 }
  0xc7   : > { %v1209_v54 = vpop.eup %1208  ;;  %v446_v55 = vmul.f32 %v1207_v51, %v1536_v34  ;;  %1216 = vrcp.f32 %v1545_v49  ;;  %vm451_vm5 = vweird.f32 %v1207_v51  ;;  %vm421_vm6 = vweird.f32 %v1205_v48 }
  0xc8   : > { %v1211_v58 = vpop.eup %1210  ;;  %v417_v59 = vsub.f32 1.0, %v416_v52  ;;  %v1562_v60 = vadd.f32 1.0, %v1209_v54  ;;  %1218 = vpow2.f32 %v1119_v47  ;;  %vm480_vm7 = vweird.f32 %v1543_v46  ;;  %vm422_vm9 = vmor %vm420_vm1, %vm421_vm6 }
  0xc9   : > { %v447_v62 = vsub.f32 1.0, %v446_v55  ;;  %v1565_v63 = vadd.f32 1.0, %v1211_v58  ;;  %v487_v7 = vor.u32 1.1754944e-38, %v486_v61  ;;  %vm510_vm8 = vweird.f32 %v1545_v49  ;;  %vm452_vm11 = vmor %vm450_vm2, %vm451_vm5 }
  0xca   : > { %1220 = vrcp.f32 %v1562_v60  ;;  %v418_v4 = vmul.f32 %v1205_v48, %v417_v59  ;;  %v439_v12 = vand.u32 2147483647, %v1562_v60  ;;  %v441_v13 = vand.u32 2147483648, %v1562_v60 }
  0xcb   : > { %v1213_v5 = vpop.eup %1212  ;;  %v448_v6 = vmul.f32 %v1207_v51, %v447_v62  ;;  %1222 = vrcp.f32 %v1565_v63  ;;  %vm1582_vm10 = vcmp.eq.f32.partialorder %v484_v3, 8.507059e+37  ;;  %v514_v18 = vand.u32 2147483647, %v1545_v49 }
  0xcc   : > { %v1215_v8 = vpop.eup %1214  ;;  %v1572_v9 = vadd.f32 1.0, %v1213_v5  ;;  %v419_v10 = vadd.f32 %v1205_v48, %v418_v4  ;;  %v516_v19 = vand.u32 2147483648, %v1545_v49  ;;  %vm435_vm13 = vweird.f32 %v1562_v60 }
  0xcd   : > { %v1576_v14 = vpop.eup %1216  ;;  %v476_v15 = vmul.f32 %v1215_v8, %v1543_v46  ;;  %v449_v16 = vadd.f32 %v1207_v51, %v448_v6  ;;  %vm481_vm12 = vweird.f32 %v1215_v8  ;;  %v442_v30 = vor.u32 1.1754944e-38, %v441_v13 }
  0xce   : > { %v1219_v20 = vpop.eup %1218  ;;  %v506_v21 = vmul.f32 %v1576_v14, %v1545_v49  ;;  %1224 = vrcp.f32 %v1572_v9  ;;  %v423_v22 = vsel %vm422_vm9, %v1205_v48, %v419_v10  ;;  %vm1605_vm14 = vcmp.eq.f32.partialorder %v439_v12, 8.507059e+37 }
  0xcf   : > { %v477_v23 = vsub.f32 1.0, %v476_v15  ;;  %v1594_v24 = vadd.f32 1.0, %v1219_v20  ;;  %v453_v25 = vsel %vm452_vm11, %v1207_v51, %v449_v16  ;;  %v428_v26 = vsel %vm1552_vm3, %v427_v0, %v423_v22  ;;  %vm482_vm3 = vmor %vm480_vm7, %vm481_vm12 }
  0xd0   : > { %v1221_v27 = vpop.eup %1220  ;;  %v507_v28 = vsub.f32 1.0, %v506_v21  ;;  %v458_v29 = vsel %vm1558_vm4, %v457_v57, %v453_v25  ;;  %1226 = vtanh.f32 %v428_v26  ;;  %vm511_vm15 = vweird.f32 %v1576_v14 }
  0xd1   : > { %v1601_v31 = vpop.eup %1222  ;;  %v478_v32 = vmul.f32 %v1215_v8, %v477_v23  ;;  %v431_v33 = vmul.f32 %v1221_v27, %v1562_v60  ;;  %1228 = vrcp.f32 %v1594_v24  ;;  %vm436_vm1 = vweird.f32 %v1221_v27  ;;  %vm1633_vm5 = vmor %vm510_vm8, %vm511_vm15 }
  0xd2   : > { %v508_v35 = vmul.f32 %v1576_v14, %v507_v28  ;;  %v461_v36 = vmul.f32 %v1601_v31, %v1565_v63  ;;  %1230 = vtanh.f32 %v458_v29  ;;  %vm1618_vm2 = vcmp.eq.f32.partialorder %v514_v18, 8.507059e+37  ;;  %vm437_vm7 = vmor %vm435_vm13, %vm436_vm1 }
  0xd3   : > { %v432_v37 = vsub.f32 1.0, %v431_v33  ;;  %v479_v39 = vadd.f32 %v1215_v8, %v478_v32  ;;  %v517_v41 = vor.u32 1.1754944e-38, %v516_v19  ;;  %vm495_vm4 = vweird.f32 %v1572_v9 }
  0xd4   : > { %v1225_v42 = vpop.eup %1224  ;;  %v462_v43 = vsub.f32 1.0, %v461_v36  ;;  %v509_v44 = vadd.f32 %v1576_v14, %v508_v35  ;;  %v499_v45 = vand.u32 2147483647, %v1572_v9  ;;  %v501_v46 = vand.u32 2147483648, %v1572_v9 }
  0xd5   : > { %v433_v47 = vmul.f32 %v1221_v27, %v432_v37  ;;  %v491_v48 = vmul.f32 %v1225_v42, %v1572_v9  ;;  %v483_v50 = vsel %vm482_vm3, %v1215_v8, %v479_v39  ;;  %vm496_vm6 = vweird.f32 %v1225_v42 }
  0xd6   : > { %v1638_v52 = vpop.eup %1226  ;;  %v463_v53 = vmul.f32 %v1601_v31, %v462_v43  ;;  %v488_v54 = vsel %vm1582_vm10, %v487_v7, %v483_v50  ;;  %v513_v55 = vsel %vm1633_vm5, %v1576_v14, %v509_v44  ;;  %vm1656_vm8 = vcmp.eq.f32.partialorder %v499_v45, 8.507059e+37  ;;  %vm497_vm10 = vmor %vm495_vm4, %vm496_vm6 }
  0xd7   : > { %v1229_v56 = vpop.eup %1228  ;;  %v492_v49 = vsub.f32 1.0, %v491_v48  ;;  %v547_v57 = vmul.f32 %v1638_v52, %v1616_v38  ;;  %1232 = vtanh.f32 %v488_v54  ;;  %v434_v58 = vadd.f32 %v1221_v27, %v433_v47  ;;  %v610_v54 = vpop.permute.xlu2 %609 }
  0xd8   : > { %v1648_v59 = vpop.eup %1230  ;;  %v521_v61 = vmul.f32 %v1229_v56, %v1594_v24  ;;  %v518_v62 = vsel %vm1618_vm2, %v517_v41, %v513_v55  ;;  %v464_v3 = vadd.f32 %v1601_v31, %v463_v53  ;;  %vm465_vm9 = vweird.f32 %v1565_v63  ;;  %v584_v55 = vpop.permute.xlu1 %583 }
  0xd9   : > { %v493_v4 = vmul.f32 %v1225_v42, %v492_v49  ;;  %v549_v5 = vmul.f32 %v1648_v59, %v1616_v38  ;;  %v555_v6 = vsel %vm341_vm0, %v547_v57, 0.0  ;;  %v438_v7 = vsel %vm437_vm7, %v1221_v27, %v434_v58 }
  0xda   : > { %v522_v8 = vsub.f32 1.0, %v521_v61  ;;  %556 = vadd.xlane.f32.xlu0 %v555_v6  ;;  %v443_v60 = vsel %vm1605_vm14, %v442_v30, %v438_v7  ;;  %1234 = vtanh.f32 %v518_v62  ;;  %vm466_vm11 = vweird.f32 %v1601_v31 }
  0xdb   : > { %v561_v10 = vsel %vm341_vm0, %v549_v5, 0.0  ;;  %1236 = vtanh.f32 %v443_v60  ;;  %v494_v12 = vadd.f32 %v1225_v42, %v493_v4  ;;  %v502_v14 = vor.u32 1.1754944e-38, %v501_v46  ;;  %vm1672_vm12 = vmor %vm465_vm9, %vm466_vm11 }
  0xdc   : > { %v523_v13 = vmul.f32 %v1229_v56, %v522_v8  ;;  %562 = vadd.xlane.f32.xlu1 %v561_v10  ;;  %v469_v16 = vand.u32 2147483647, %v1565_v63  ;;  %v471_v17 = vand.u32 2147483648, %v1565_v63  ;;  %v468_v9 = vsel %vm1672_vm12, %v1601_v31, %v464_v3 }
  0xdd   : > { %v1678_v18 = vpop.eup %1232  ;;  %v498_v19 = vsel %vm497_vm10, %v1225_v42, %v494_v12  ;;  %vm525_vm13 = vweird.f32 %v1594_v24  ;;  %vm526_vm14 = vweird.f32 %v1229_v56  ;;  %v529_v23 = vand.u32 2147483647, %v1594_v24 }
  0xde   : > { %v551_v20 = vmul.f32 %v1678_v18, %v1616_v38  ;;  %v503_v21 = vsel %vm1656_vm8, %v502_v14, %v498_v19  ;;  %v472_v22 = vor.u32 1.1754944e-38, %v471_v17  ;;  %vm470_vm15 = vcmp.eq.f32.partialorder %v469_v16, 8.507059e+37  ;;  %vm527_vm1 = vmor %vm525_vm13, %vm526_vm14 }
  0xdf   : > { %1238 = vtanh.f32 %v503_v21  ;;  %v524_v63 = vadd.f32 %v1229_v56, %v523_v13  ;;  %v531_v25 = vand.u32 2147483648, %v1594_v24  ;;  %vm530_vm2 = vcmp.eq.f32.partialorder %v529_v23, 8.507059e+37 }
  0xe0   : > { %v1690_v26 = vpop.eup %1234  ;;  %v567_v27 = vsel %vm341_vm0, %v551_v20, 0.0  ;;  %v473_v28 = vsel %vm470_vm15, %v472_v22, %v468_v9  ;;  %v618_v45 = vperm.slane %v1528_v11, 2  ;;  %v625_v48 = vperm.slane %v1528_v11, 3 }
  0xe1   : > { %v1693_v29 = vpop.eup %1236  ;;  %568 = vadd.xlane.f32.xlu2 %v567_v27  ;;  %v528_v30 = vsel %vm527_vm1, %v1229_v56, %v524_v63  ;;  %v532_v32 = vor.u32 1.1754944e-38, %v531_v25  ;;  %1240 = vtanh.f32 %v473_v28  ;;  %v553_v24 = vmul.f32 %v1690_v26, %v1616_v38 }
  0xe2   : > { %v548_v31 = vmul.f32 %v1693_v29, %v1616_v38  ;;  %v639_v50 = vperm.slane %v1528_v11, 5  ;;  %v611_v51 = vperm.slane %v1528_v11, 1  ;;  %v632_v46 = vperm.slane %v1528_v11, 4 }
  0xe3   : > { %v533_v34 = vsel %vm530_vm2, %v532_v32, %v528_v30  ;;  %v573_v36 = vsel %vm341_vm0, %v553_v24, 0.0  ;;  %v646_v53 = vperm.slane %v1528_v11, 6  ;;  %vm718_vm3 = vcmask 1041409  }
  0xe4   : > { %v558_v33 = vsel %vm341_vm0, %v548_v31, 0.0  ;;  %1242 = vtanh.f32 %v533_v34  ;;  %vm720_vm4 = vcmask 1042434   ;;  %vm722_vm5 = vcmask 1043459  }
  0xe5   : > { %v1700_v35 = vpop.eup %1238  ;;  %559 = vadd.xlane.f32.xlu0 %v558_v33  ;;  %vm724_vm6 = vcmask 1044484   ;;  %vm726_vm7 = vcmask 1045509   ;;  %vm728_vm8 = vcmask 1046534   ;;  %vm730_vm9 = vcmask 1047559  }
  0xe6   : > { %v552_v37 = vmul.f32 %v1700_v35, %v1616_v38  ;;  %vm733_vm10 = vcmask 64512  }
  0xe7   : > { %v1705_v39 = vpop.eup %1240 }
  0xe8   : > { %v570_v40 = vsel %vm341_vm0, %v552_v37, 0.0  ;;  %v550_v41 = vmul.f32 %v1705_v39, %v1616_v38 }
  0xe9   : > { %574 = vadd.xlane.f32.xlu2 %v573_v36 }
  0xea   : > { %v1710_v42 = vpop.eup %1242  ;;  %v564_v43 = vsel %vm341_vm0, %v550_v41, 0.0  ;;  %v1748_v41 = vand.u32 127, %v605_v1 }
  0xeb   : > { %v554_v44 = vmul.f32 %v1710_v42, %v1616_v38  ;;  %v653_v38 = vperm.slane %v1528_v11, 7 }
  0xed   : > { %571 = vadd.xlane.f32.xlu0 %v570_v40  ;;  %v576_v47 = vsel %vm341_vm0, %v554_v44, 0.0 }
  0xf1   : > { %565 = vadd.xlane.f32.xlu2 %v564_v43 }
  0xf5   : > { %577 = vadd.xlane.f32.xlu0 %v576_v47  ;;  %623 = vperm.xlu1 %1189, %v618_v45  }
  0xfd   : > { %630 = vperm.xlu1 %1189, %v625_v48  }
 0x105   : > { %644 = vperm.xlu1 %1189, %v639_v50  }
 0x109   : > { %616 = vperm.xlu0 %1188, %v611_v51   ;;  %637 = vperm.xlu2 %1187, %v632_v46  }
 0x10d   : > { %658 = vperm.xlu1 %1189, %v653_v38  }
 0x111   : > { %651 = vperm.xlu2 %1187, %v646_v53   ;;  %1191 = vset.pattern.permute.xlu0 %v1378_v2 }
 0x115   : > { %1192 = vset.pattern.permute.xlu1 %v1378_v2 }
 0x119   : > { %1190 = vset.pattern.permute.xlu2 %v1378_v2 }
 0x14d   : > { %v557_v56 = vpop.xlane.xlu0 %556 }
 0x14e   : > { %v586_v49 = vadd.f32 %v584_v55, %v557_v56 }
 0x14f   : > { %v563_v62 = vpop.xlane.xlu1 %562 }
 0x150   : > { %1244 = vtanh.f32 %v586_v49  ;;  %v588_v0 = vadd.f32 %v584_v55, %v563_v62 }
 0x152   : > { %1246 = vtanh.f32 %v588_v0 }
 0x154   : > { %v569_v57 = vpop.xlane.xlu2 %568 }
 0x155   : > { %v590_v4 = vadd.f32 %v584_v55, %v569_v57 }
 0x156   : > { %v1245_v58 = vpop.eup %1244 }
 0x157   : > { %v1726_v61 = vadd.f32 %v1245_v58, %v610_v54  ;;  %1248 = vtanh.f32 %v590_v4 }
 0x158   : > { %v560_v3 = vpop.xlane.xlu0 %559  ;;  %v1247_v2 = vpop.eup %1246 }
 0x159   : > { %685 = vperm.xlu2 %1190, %v1726_v61   ;;  %v587_v19 = vadd.f32 %v584_v55, %v560_v3 }
 0x15c   : > { %v575_v11 = vpop.xlane.xlu2 %574 }
 0x15d   : > { %v1249_v10 = vpop.eup %1248  ;;  %v592_v63 = vadd.f32 %v584_v55, %v575_v11 }
 0x160   : > { %v572_v8 = vpop.xlane.xlu0 %571 }
 0x161   : > { %v591_v14 = vadd.f32 %v584_v55, %v572_v8 }
 0x164   : > { %v566_v5 = vpop.xlane.xlu2 %565 }
 0x165   : > { %v589_v6 = vadd.f32 %v584_v55, %v566_v5 }
 0x167   : > { %1250 = vtanh.f32 %v589_v6  ;;  %v624_v7 = vpop.permute.xlu1 %623 }
 0x168   : > { %v1729_v60 = vadd.f32 %v1247_v2, %v624_v7  ;;  %1252 = vtanh.f32 %v591_v14  ;;  %v578_v9 = vpop.xlane.xlu0 %577 }
 0x169   : > { %1254 = vtanh.f32 %v587_v19  ;;  %v593_v20 = vadd.f32 %v584_v55, %v578_v9 }
 0x16a   : > { %691 = vperm.xlu0 %1191, %v1729_v60  }
 0x16b   : > { %1256 = vtanh.f32 %v593_v20 }
 0x16c   : > { %v638_v12 = vpop.permute.xlu2 %637  ;;  %1258 = vtanh.f32 %v592_v63 }
 0x16d   : > { %v1251_v13 = vpop.eup %1250  ;;  %v1732_v15 = vadd.f32 %v1249_v10, %v638_v12 }
 0x16e   : > { %v1253_v21 = vpop.eup %1252 }
 0x16f   : > { %v631_v16 = vpop.permute.xlu1 %630  ;;  %697 = vperm.xlu1 %1192, %v1732_v15   ;;  %v1255_v25 = vpop.eup %1254 }
 0x170   : > { %v1735_v17 = vadd.f32 %v1251_v13, %v631_v16 }
 0x171   : > { %v1257_v30 = vpop.eup %1256 }
 0x172   : > { %694 = vperm.xlu2 %1190, %v1735_v17   ;;  %v1259_v24 = vpop.eup %1258 }
 0x174   : > { %v652_v33 = vpop.permute.xlu2 %651 }
 0x175   : > { %v1744_v34 = vadd.f32 %v1259_v24, %v652_v33 }
 0x177   : > { %v645_v22 = vpop.permute.xlu1 %644 }
 0x178   : > { %v1738_v23 = vadd.f32 %v1253_v21, %v645_v22 }
 0x17a   : > { %700 = vperm.xlu2 %1190, %v1738_v23  }
 0x17b   : > { %v617_v27 = vpop.permute.xlu0 %616 }
 0x17c   : > { %v669_v28 = vadd.f32 %v1255_v25, %v617_v27 }
 0x17e   : > { %688 = vperm.xlu1 %1192, %v669_v28  }
 0x17f   : > { %v659_v31 = vpop.permute.xlu1 %658 }
 0x180   : > { %v1741_v32 = vadd.f32 %v1257_v30, %v659_v31 }
 0x182   : > { %706 = vperm.xlu0 %1191, %v1741_v32  }
 0x186   : > { %703 = vperm.xlu1 %1192, %v1744_v34  }
 0x1b3   : > { %v686_v36 = vpop.permute.xlu2 %685 }
 0x1b4   : > { %v710_v45 = vperm.slane %v686_v36, %v1748_v41 }
 0x1cc   : > { %v695_v40 = vpop.permute.xlu2 %694 }
 0x1cd   : > { %v713_v50 = vperm.slane %v695_v40, %v1748_v41 }
 0x1d4   : > { %v701_v1 = vpop.permute.xlu2 %700 }
 0x1d5   : > { %v715_v56 = vperm.slane %v701_v1, %v1748_v41 }
 0x1dc   : > { %v692_v43 = vpop.permute.xlu0 %691 }
 0x1dd   : > { %v712_v48 = vperm.slane %v692_v43, %v1748_v41 }
 0x1e1   : > { %v698_v37 = vpop.permute.xlu1 %697 }
 0x1e2   : > { %v714_v38 = vperm.slane %v698_v37, %v1748_v41 }
 0x1f0   : > { %v689_v44 = vpop.permute.xlu1 %688 }
 0x1f1   : > { %v711_v47 = vperm.slane %v689_v44, %v1748_v41 }
 0x1f3   : > { %v719_v51 = vsel %vm718_vm3, %v711_v47, %v710_v45 }
 0x1f4   : > { %v721_v46 = vsel %vm720_vm4, %v712_v48, %v719_v51  ;;  %v707_v54 = vpop.permute.xlu0 %706 }
 0x1f5   : > { %v723_v53 = vsel %vm722_vm5, %v713_v50, %v721_v46  ;;  %v717_v58 = vperm.slane %v707_v54, %v1748_v41 }
 0x1f6   : > { %v725_v55 = vsel %vm724_vm6, %v714_v38, %v723_v53 }
 0x1f7   : > { %v727_v62 = vsel %vm726_vm7, %v715_v56, %v725_v55 }
 0x1f8   : > { %v704_v49 = vpop.permute.xlu1 %703 }
 0x1f9   : > { %v716_v57 = vperm.slane %v704_v49, %v1748_v41 }
 0x1fb   : > { %v729_v11 = vsel %vm728_vm8, %v716_v57, %v727_v62 }
 0x1fc   : > { %v731_v0 = vsel %vm730_vm9, %v717_v58, %v729_v11 }
 0x1fd   : > { %v734_v3 = vsel %vm733_vm10, %v731_v0, -inf }
 0x1fe   : > { %735 = vmax.xlane.f32.xlu2 %v734_v3 }
 0x271   : > { %v736_v4 = vpop.xlane.xlu2 %735 }
 0x272   : > { %v739_v5 = vperm.slane %v736_v4, 1  ;;  %v738_v6 = vperm.slane %v736_v4, 0  ;;  %v741_v8 = vperm.slane %v736_v4, 3  ;;  %v740_v10 = vperm.slane %v736_v4, 2 }
 0x273   : > { %v743_v9 = vperm.slane %v736_v4, 5  ;;  %v742_v21 = vperm.slane %v736_v4, 4  ;;  %v744_v30 = vperm.slane %v736_v4, 6 }
 0x274   : > { %v755_v2 = vsub.f32 %v669_v28, %v739_v5  ;;  %v754_v7 = vsub.f32 %v1726_v61, %v738_v6  ;;  %v757_v14 = vsub.f32 %v1735_v17, %v741_v8  ;;  %v756_v16 = vsub.f32 %v1729_v60, %v740_v10 }
 0x275   : > { %v759_v61 = vsub.f32 %v1738_v23, %v743_v9  ;;  %v758_v25 = vsub.f32 %v1732_v15, %v742_v21  ;;  %v745_v28 = vperm.slane %v736_v4, 7  ;;  %v760_v24 = vsub.f32 %v1744_v34, %v744_v30 }
 0x276   : > { %v764_v12 = vmul.f32 1.442695, %v755_v2  ;;  %v762_v13 = vmul.f32 1.442695, %v754_v7  ;;  %v768_v19 = vmul.f32 1.442695, %v757_v14 }
 0x277   : > { %v766_v20 = vmul.f32 1.442695, %v756_v16  ;;  %v772_v27 = vmul.f32 1.442695, %v759_v61  ;;  %v770_v17 = vmul.f32 1.442695, %v758_v25  ;;  %v761_v33 = vsub.f32 %v1741_v32, %v745_v28 }
 0x278   : > { %1260 = vpow2.f32 %v764_v12  ;;  %v774_v36 = vmul.f32 1.442695, %v760_v24 }
 0x279   : > { %1262 = vpow2.f32 %v762_v13  ;;  %v776_v23 = vmul.f32 1.442695, %v761_v33 }
 0x27a   : > { %1264 = vpow2.f32 %v768_v19 }
 0x27b   : > { %1266 = vpow2.f32 %v766_v20 }
 0x27c   : > { %1268 = vpow2.f32 %v772_v27 }
 0x27d   : > { %1270 = vpow2.f32 %v770_v17 }
 0x27e   : > { %v1261_v22 = vpop.eup %1260  ;;  %1272 = vpow2.f32 %v776_v23 }
 0x27f   : > { %v1263_v63 = vpop.eup %1262  ;;  %790 = vperm.xlu0 %1191, %v1261_v22   ;;  %1274 = vpow2.f32 %v774_v36 }
 0x280   : > { %787 = vperm.xlu1 %1192, %v1263_v63   ;;  %v1771_v31 = vpop.eup %1264 }
 0x281   : > { %v1267_v60 = vpop.eup %1266 }
 0x282   : > { %v1269_v37 = vpop.eup %1268 }
 0x283   : > { %v1271_v15 = vpop.eup %1270 }
 0x284   : > { %v1273_v40 = vpop.eup %1272 }
 0x285   : > { %v1275_v43 = vpop.eup %1274 }
 0x287   : > { %796 = vperm.xlu0 %1191, %v1771_v31  }
 0x288   : > { %793 = vperm.xlu1 %1192, %v1267_v60  }
 0x28f   : > { %802 = vperm.xlu0 %1191, %v1269_v37  }
 0x290   : > { %799 = vperm.xlu1 %1192, %v1271_v15  }
 0x297   : > { %808 = vperm.xlu0 %1191, %v1273_v40  }
 0x298   : > { %805 = vperm.xlu1 %1192, %v1275_v43  }
 0x2f1   : > { %v791_v44 = vpop.permute.xlu0 %790 }
 0x2f2   : > { %v788_v45 = vpop.permute.xlu1 %787  ;;  %v811_v32 = vperm.slane %v791_v44, %v1748_v41 }
 0x2f3   : > { %v810_v34 = vperm.slane %v788_v45, %v1748_v41 }
 0x2f5   : > { %v818_v1 = vsel %vm718_vm3, %v811_v32, %v810_v34 }
 0x2f9   : > { %v797_v47 = vpop.permute.xlu0 %796 }
 0x2fa   : > { %v794_v48 = vpop.permute.xlu1 %793  ;;  %v813_v38 = vperm.slane %v797_v47, %v1748_v41 }
 0x2fb   : > { %v812_v50 = vperm.slane %v794_v48, %v1748_v41 }
 0x2fd   : > { %v819_v53 = vsel %vm720_vm4, %v812_v50, %v818_v1 }
 0x2fe   : > { %v820_v56 = vsel %vm722_vm5, %v813_v38, %v819_v53 }
 0x301   : > { %v803_v51 = vpop.permute.xlu0 %802 }
 0x302   : > { %v800_v46 = vpop.permute.xlu1 %799  ;;  %v815_v55 = vperm.slane %v803_v51, %v1748_v41 }
 0x303   : > { %v814_v54 = vperm.slane %v800_v46, %v1748_v41 }
 0x305   : > { %v821_v49 = vsel %vm724_vm6, %v814_v54, %v820_v56 }
 0x306   : > { %v822_v0 = vsel %vm726_vm7, %v815_v55, %v821_v49 }
 0x309   : > { %v809_v57 = vpop.permute.xlu0 %808 }
 0x30a   : > { %v817_v58 = vperm.slane %v809_v57, %v1748_v41  ;;  %v806_v62 = vpop.permute.xlu1 %805 }
 0x30b   : > { %v816_v11 = vperm.slane %v806_v62, %v1748_v41 }
 0x30d   : > { %v823_v3 = vsel %vm728_vm8, %v816_v11, %v822_v0 }
 0x30e   : > { %v824_v4 = vsel %vm730_vm9, %v817_v58, %v823_v3 }
 0x30f   : > { %v826_v5 = vsel %vm733_vm10, %v824_v4, 0.0 }
 0x310   : > { %827 = vadd.xlane.f32.xlu1 %v826_v5 }
 0x383   : > { %v828_v6 = vpop.xlane.xlu1 %827 }
 0x384   : > { %1276 = vrcp.f32 %v828_v6 }
 0x38a   : > { %v1277_v2 = vpop.eup %1276 }
 0x38b   : > { %v832_v7 = vperm.slane %v1277_v2, 1  ;;  %v831_v8 = vperm.slane %v1277_v2, 0  ;;  %v836_v13 = vperm.slane %v1277_v2, 5  ;;  %v833_v41 = vperm.slane %v1277_v2, 2 }
 0x38c   : > { %v838_v19 = vperm.slane %v1277_v2, 7  ;;  %v834_v9 = vperm.slane %v1277_v2, 3  ;;  %v835_v61 = vperm.slane %v1277_v2, 4 }
 0x38d   : > { %v848_v10 = vmul.f32 %v1261_v22, %v832_v7  ;;  %v847_v12 = vmul.f32 %v1263_v63, %v831_v8  ;;  %v852_v14 = vmul.f32 %v1269_v37, %v836_v13  ;;  %v849_v16 = vmul.f32 %v1267_v60, %v833_v41 }
 0x38e   : > { %v854_v20 = vmul.f32 %v1273_v40, %v838_v19  ;;  %v850_v21 = vmul.f32 %v1771_v31, %v834_v9  ;;  %v851_v25 = vmul.f32 %v1271_v15, %v835_v61  ;;  %v837_v22 = vperm.slane %v1277_v2, 6 }
 0x38f   : > { %862 = vperm.xlu2 %1190, %v848_v10   ;;  %857 = vperm.xlu0 %1191, %v847_v12  }
 0x390   : > { %v853_v63 = vmul.f32 %v1275_v43, %v837_v22 }
 0x397   : > { %882 = vperm.xlu2 %1190, %v852_v14   ;;  %867 = vperm.xlu0 %1191, %v849_v16  }
 0x39f   : > { %892 = vperm.xlu2 %1190, %v854_v20   ;;  %872 = vperm.xlu0 %1191, %v850_v21  }
 0x3a7   : > { %877 = vperm.xlu0 %1191, %v851_v25  }
 0x3af   : > { %887 = vperm.xlu0 %1191, %v853_v63  }
 0x3e9   : > { %v863_v27 = vpop.permute.xlu2 %862 }
 0x3ea   : > { %v896_v24 = vmul.f32 %v1693_v29, %v863_v27 }
 0x3ec   : > { %v910_v36 = vsel %vm341_vm0, %v896_v24, 0.0 }
 0x3ed   : > { %v911_v47 = vrot.slane %v910_v36, 4 }
 0x3ef   : > { %v912_v50 = vadd.f32 %v911_v47, %v910_v36 }
 0x3f1   : > { %v883_v17 = vpop.permute.xlu2 %882  ;;  %v913_v54 = vrot.slane %v912_v50, 2 }
 0x3f2   : > { %v900_v44 = vmul.f32 %v1700_v35, %v883_v17 }
 0x3f3   : > { %v914_v0 = vadd.f32 %v913_v54, %v912_v50 }
 0x3f4   : > { %v938_v32 = vsel %vm341_vm0, %v900_v44, 0.0 }
 0x3f5   : > { %v939_v38 = vrot.slane %v938_v32, 4  ;;  %v915_v12 = vrot.slane %v914_v0, 1 }
 0x3f7   : > { %v940_v57 = vadd.f32 %v939_v38, %v938_v32  ;;  %v916_v25 = vadd.f32 %v915_v12, %v914_v0 }
 0x3f9   : > { %v893_v15 = vpop.permute.xlu2 %892  ;;  %v941_v2 = vrot.slane %v940_v57, 2 }
 0x3fb   : > { %v942_v9 = vadd.f32 %v941_v2, %v940_v57 }
 0x401   : > { %v858_v28 = vpop.permute.xlu0 %857 }
 0x402   : > { %v895_v60 = vmul.f32 %v1638_v52, %v858_v28  ;;  %v943_v28 = vrot.slane %v942_v9, 1 }
 0x404   : > { %v903_v31 = vsel %vm341_vm0, %v895_v60, 0.0  ;;  %v944_v36 = vadd.f32 %v943_v28, %v942_v9 }
 0x405   : > { %v904_v40 = vrot.slane %v903_v31, 4 }
 0x407   : > { %v905_v48 = vadd.f32 %v904_v40, %v903_v31 }
 0x409   : > { %v868_v30 = vpop.permute.xlu0 %867 }
 0x40a   : > { %v897_v33 = vmul.f32 %v1648_v59, %v868_v30  ;;  %v902_v59 = vmul.f32 %v1710_v42, %v893_v15 }
 0x40c   : > { %v917_v23 = vsel %vm341_vm0, %v897_v33, 0.0  ;;  %v952_v46 = vsel %vm341_vm0, %v902_v59, 0.0 }
 0x40d   : > { %v918_v45 = vrot.slane %v917_v23, 4  ;;  %v953_v55 = vrot.slane %v952_v46, 4 }
 0x40f   : > { %v919_v34 = vadd.f32 %v918_v45, %v917_v23  ;;  %v954_v3 = vadd.f32 %v953_v55, %v952_v46 }
 0x411   : > { %v873_v37 = vpop.permute.xlu0 %872  ;;  %v920_v53 = vrot.slane %v919_v34, 2  ;;  %v955_v13 = vrot.slane %v954_v3, 2 }
 0x412   : > { %v898_v43 = vmul.f32 %v1705_v39, %v873_v37  ;;  %v906_v39 = vrot.slane %v905_v48, 2 }
 0x413   : > { %v921_v62 = vadd.f32 %v920_v53, %v919_v34  ;;  %v956_v22 = vadd.f32 %v955_v13, %v954_v3 }
 0x414   : > { %v924_v52 = vsel %vm341_vm0, %v898_v43, 0.0  ;;  %v907_v58 = vadd.f32 %v906_v39, %v905_v48 }
 0x415   : > { %v925_v29 = vrot.slane %v924_v52, 4  ;;  %v922_v8 = vrot.slane %v921_v62, 1  ;;  %v957_v33 = vrot.slane %v956_v22, 1 }
 0x416   : > { %v908_v7 = vrot.slane %v907_v58, 1 }
 0x417   : > { %v926_v51 = vadd.f32 %v925_v29, %v924_v52  ;;  %v923_v21 = vadd.f32 %v922_v8, %v921_v62  ;;  %v958_v15 = vadd.f32 %v957_v33, %v956_v22 }
 0x418   : > { %v909_v20 = vadd.f32 %v908_v7, %v907_v58 }
 0x419   : > { %v878_v1 = vpop.permute.xlu0 %877  ;;  %v927_v56 = vrot.slane %v926_v51, 2 }
 0x41a   : > { %v899_v35 = vmul.f32 %v1678_v18, %v878_v1  ;;  %v967_v17 = vsel %vm718_vm3, %v916_v25, %v909_v20 }
 0x41b   : > { %v928_v4 = vadd.f32 %v927_v56, %v926_v51  ;;  %v968_v30 = vsel %vm720_vm4, %v923_v21, %v967_v17 }
 0x41c   : > { %v931_v42 = vsel %vm341_vm0, %v899_v35, 0.0 }
 0x41d   : > { %v932_v49 = vrot.slane %v931_v42, 4  ;;  %v929_v41 = vrot.slane %v928_v4, 1 }
 0x41f   : > { %v933_v11 = vadd.f32 %v932_v49, %v931_v42  ;;  %v930_v63 = vadd.f32 %v929_v41, %v928_v4 }
 0x421   : > { %v934_v5 = vrot.slane %v933_v11, 2  ;;  %v888_v6 = vpop.permute.xlu0 %887  ;;  %v969_v24 = vsel %vm722_vm5, %v930_v63, %v968_v30 }
 0x422   : > { %v901_v18 = vmul.f32 %v1690_v26, %v888_v6 }
 0x423   : > { %v935_v10 = vadd.f32 %v934_v5, %v933_v11 }
 0x424   : > { %v945_v14 = vsel %vm341_vm0, %v901_v18, 0.0 }
 0x425   : > { %v936_v16 = vrot.slane %v935_v10, 1  ;;  %v946_v19 = vrot.slane %v945_v14, 4 }
 0x427   : > { %v947_v61 = vadd.f32 %v946_v19, %v945_v14  ;;  %v937_v26 = vadd.f32 %v936_v16, %v935_v10 }
 0x429   : > { %v948_v27 = vrot.slane %v947_v61, 2  ;;  %v970_v31 = vsel %vm724_vm6, %v937_v26, %v969_v24 }
 0x42a   : > { %v971_v40 = vsel %vm726_vm7, %v944_v36, %v970_v31 }
 0x42b   : > { %v949_v60 = vadd.f32 %v948_v27, %v947_v61 }
 0x42d   : > { %v950_v23 = vrot.slane %v949_v60, 1 }
 0x42f   : > { %v951_v37 = vadd.f32 %v950_v23, %v949_v60 }
 0x431   : > { %v972_v43 = vsel %vm728_vm8, %v951_v37, %v971_v40 }
 0x432   : > { %v973_v44 = vsel %vm730_vm9, %v958_v15, %v972_v43 }
 0x433   : > { %975 = vst.msk [vmem:[%s286_s5] sm:$0xff] %vm341_vm0, %v973_v44 }
 0x434   : > { %1335 = shalt.err (!%p1332_p7)
}
 0x435   : > { %1139 = dma.vmem_to_hbm [thread:$0]  (%p1467_p11), %s990_s22, 128, %s992_s9, %s977_s30  }
 0x436 PF: > { %s1003_s17 = sand.u32 1, %s1362_s23   ;;  %p1879_p5 = scmp.ge.s32.totalorder %s1374_s26, 2 }
 0x437   : > { %s1004_s27 = scalar_lea.sflag [#allocation5], %s1003_s17 }
 0x438   : > { %p1146_p8 = pnand %p1879_p5, %p1471_p12 }
 0x43a   : > { %p1147_p10 = pneg %p1146_p8 }
 0x43c   : > { %1357 = dma.done.wait (%p1147_p10), %s1004_s27, 128  }
 0x43d   : > { %1359 = vsyncadd (%p1147_p10), %s1004_s27, 4294967168  ;;  %p21_p2 = scmp.ge.s32.totalorder %s1442_s28, 4   ;;  %s1880_s23 = smov %s1366_s24 }
 0x43e   : > { %s1881_s24 = smov %s1370_s25  ;;  %s1882_s25 = smov %s1454_s7 }
 0x43f   : > { %s1883_s26 = smov %s1442_s28  ;;  %23 = sbr.rel (!%p21_p2) target bundleno = 8 (0x8), region = 92 }
 0x444   :  { %1010 = vsyncpa [#allocation4], 1 }
 0x445   :  { %1012 = vsyncpa [#allocation4 + $0x1], 1 }
 0x446   :  { %1013 = vsyncpa [#allocation5], 1 }
 0x447   :  { %1015 = vsyncpa [#allocation5 + $0x1], 1 }

</bundles_post_ra>
